<compile_context>
chip_gen: v6e
topology: v6e:2x2x1
jax: 0.10.0
libtpu: 0.0.40
codegen_flags: <defaults>
</compile_context>

<pallas_src>
import jax
import jax.numpy as jnp
from jax import lax
from jax.experimental import pallas as pl
from jax.experimental.pallas import tpu as pltpu


# --------------------------------------------------------------------------
# Feature extractor: im2col (wrapper) + single matmul + LeakyReLU (kernel)
# --------------------------------------------------------------------------
def _conv_mm_lrelu_kernel(p_ref, w_ref, b_ref, o_ref):
    # p_ref: (B, K, N) im2col patches    w_ref: (Cout, K)
    # b_ref: (Cout, 1)                   o_ref: (B, Cout, N)  (torch layout)
    w = w_ref[...]
    bias = b_ref[...]
    for bi in range(p_ref.shape[0]):                 # tiny static unroll over batch
        acc = jnp.dot(w, p_ref[bi], preferred_element_type=jnp.float32)  # (Cout, N)
        acc = acc + bias                             # lane-dense bias add
        o_ref[bi] = jnp.where(acc > 0, acc, 0.01 * acc)   # LeakyReLU(0.01)


def conv3x3_features(x_nchw, w_flat, b_col):
    """x_nchw: (B, Cin, H, W) -> features (B, Cout, H*W) (torch .view order)."""
    B, Cin, H, W = x_nchw.shape
    Cout, K = w_flat.shape
    N = H * W
    x = x_nchw.astype(jnp.float32)
    xpad = jnp.pad(x, ((0, 0), (0, 0), (1, 1), (1, 1)))
    # im2col: (B, 9, Cin, H, W) -> (B, 9*Cin, H*W); tap order (ky, kx, cin)
    # matches the pre-flattened weight layout.
    cols = jnp.stack(
        [xpad[:, :, ky:ky + H, kx:kx + W] for ky in range(3) for kx in range(3)],
        axis=1)
    patches = cols.reshape(B, K, N)

    return pl.pallas_call(
        _conv_mm_lrelu_kernel,
        out_shape=jax.ShapeDtypeStruct((B, Cout, N), jnp.float32),
        in_specs=[pl.BlockSpec(memory_space=pltpu.MemorySpace.VMEM)] * 3,
        out_specs=pl.BlockSpec(memory_space=pltpu.MemorySpace.VMEM),
    )(patches, w_flat, b_col)


# --------------------------------------------------------------------------
# Loss kernels on flattened features (Bf, C, N), tiled over N
# --------------------------------------------------------------------------
def _spatial_tile(n):
    # Lane-dense reduction tile: keep whole N when small, else 512-wide chunks.
    if n > 512 and n % 512 == 0:
        return 512
    return n


def _gram_loss(fo, ft):
    Bf, C, N = fo.shape
    tn = _spatial_tile(N)
    nk = N // tn

    def kernel(fo_ref, ft_ref, o_ref, go_scr, gt_scr):
        k = pl.program_id(0)

        @pl.when(k == 0)
        def _():
            go_scr[...] = jnp.zeros_like(go_scr)
            gt_scr[...] = jnp.zeros_like(gt_scr)

        dims = (((2,), (2,)), ((0,), (0,)))          # batched f @ f.T over N tile
        fo_b = fo_ref[...]
        ft_b = ft_ref[...]
        go_scr[...] += lax.dot_general(fo_b, fo_b, dims,
                                       preferred_element_type=jnp.float32)
        gt_scr[...] += lax.dot_general(ft_b, ft_b, dims,
                                       preferred_element_type=jnp.float32)

        @pl.when(k == nk - 1)
        def _():
            # Normalize once at the end: Gram scale 1/(C*N), L1-mean 1/(Bf*C*C).
            diff = jnp.sum(jnp.abs(go_scr[...] - gt_scr[...]))
            o_ref[0, 0] = diff / jnp.float32(C * N) / jnp.float32(Bf * C * C)

    out = pl.pallas_call(
        kernel,
        out_shape=jax.ShapeDtypeStruct((1, 1), jnp.float32),
        grid=(nk,),
        in_specs=[pl.BlockSpec((Bf, C, tn), lambda k: (0, 0, k)),
                  pl.BlockSpec((Bf, C, tn), lambda k: (0, 0, k))],
        out_specs=pl.BlockSpec((1, 1), lambda k: (0, 0),
                               memory_space=pltpu.MemorySpace.SMEM),
        scratch_shapes=[pltpu.VMEM((Bf, C, C), jnp.float32),
                        pltpu.VMEM((Bf, C, C), jnp.float32)],
        compiler_params=pltpu.CompilerParams(
            dimension_semantics=("arbitrary",)),
    )(fo, ft)
    return out[0, 0]


def _l1_loss(fo, ft):
    Bf, C, N = fo.shape
    tn = _spatial_tile(N)
    nk = N // tn
    inv_total = 1.0 / float(Bf * C * N)

    def kernel(fo_ref, ft_ref, o_ref, acc_scr):
        k = pl.program_id(0)

        @pl.when(k == 0)
        def _():
            acc_scr[0, 0] = jnp.float32(0.0)

        acc_scr[0, 0] += jnp.sum(jnp.abs(fo_ref[...] - ft_ref[...]))

        @pl.when(k == nk - 1)
        def _():
            o_ref[0, 0] = acc_scr[0, 0] * jnp.float32(inv_total)

    out = pl.pallas_call(
        kernel,
        out_shape=jax.ShapeDtypeStruct((1, 1), jnp.float32),
        grid=(nk,),
        in_specs=[pl.BlockSpec((Bf, C, tn), lambda k: (0, 0, k)),
                  pl.BlockSpec((Bf, C, tn), lambda k: (0, 0, k))],
        out_specs=pl.BlockSpec((1, 1), lambda k: (0, 0),
                               memory_space=pltpu.MemorySpace.SMEM),
        scratch_shapes=[pltpu.SMEM((1, 1), jnp.float32)],
        compiler_params=pltpu.CompilerParams(
            dimension_semantics=("arbitrary",)),
    )(fo, ft)
    return out[0, 0]


# --------------------------------------------------------------------------
# PerceptualLoss wrapper (mirrors the reference forward / _compute semantics)
# --------------------------------------------------------------------------
class PerceptualLossPallas:
    def __init__(self, c_in=4, c_out=8,
                 losses=(("Gram", 1.0), ("torch_nn_L1Loss", 1.0)),
                 shape=(16, 16)):
        kw, kb = jax.random.split(jax.random.PRNGKey(42))
        # Deterministic synthetic weights for the tapped conv block.
        w = 0.1 * jax.random.normal(kw, (3, 3, c_in, c_out), jnp.float32)
        b = 0.1 * jax.random.normal(kb, (c_out,), jnp.float32)
        # Pre-flatten once to the im2col layout: (Cout, 9*Cin), taps ordered (ky,kx,cin).
        self.w_flat = jnp.transpose(w.reshape(9 * c_in, c_out), (1, 0))
        self.b_col = b.reshape(c_out, 1)
        self.losses = list(losses)
        self.shape = shape   # 2-D shape -> 'bilinear' branch of the reference

    def _features(self, x_nchw):
        return conv3x3_features(x_nchw, self.w_flat, self.b_col)

    def _compute(self, output, targets, norm_batch):
        # Reference: loss += weight * loss_fn(feat_o, feat_t) / batch, with its
        # zip() pairing target[0] <-> 'Gram', target[1] <-> 'torch_nn_L1Loss'.
        loss = jnp.zeros((), jnp.float32)
        feat_out = self._features(output)             # (Bf, C, N)
        for (name, weight), target in zip(self.losses, targets):
            feat_tgt = self._features(target)
            if name == "Gram":
                lv = _gram_loss(feat_out, feat_tgt)
            else:
                lv = _l1_loss(feat_out, feat_tgt)
            loss = loss + weight * lv / norm_batch
        return loss

    def __call__(self, output, *targets):
        if output.ndim == 5 and len(self.shape) == 2:
            # Fold depth into batch: one long pipelined feature extraction
            # instead of D separate launches.  Both losses are mean-based, so
            # dividing by the original per-slice batch B reproduces the
            # reference's  sum_i _compute(slice_i) / D  exactly.
            B, C, D, H, W = output.shape
            fold = lambda t: jnp.transpose(t, (0, 2, 1, 3, 4)).reshape(B * D, C, H, W)
            loss = self._compute(fold(output), [fold(t) for t in targets],
                                 norm_batch=B)
        else:
            loss = self._compute(output, list(targets),
                                 norm_batch=output.shape[0])
        # Reference returns a shape-(1,) tensor cast to output's dtype.
        return loss.reshape(1).astype(output.dtype)


if __name__ == "__main__":
    key = jax.random.PRNGKey(0)
    k1, k2, k3 = jax.random.split(key, 3)
    B, C, H, W = 2, 4, 16, 16
    output = jax.random.normal(k1, (B, C, H, W), jnp.float32)
    target_a = jax.random.normal(k2, (B, C, H, W), jnp.float32)   # paired with Gram
    target_b = jax.random.normal(k3, (B, C, H, W), jnp.float32)   # paired with L1

    loss_fn = PerceptualLossPallas(c_in=C, c_out=8, shape=(H, W))
    loss = jax.jit(lambda o, ta, tb: loss_fn(o, ta, tb))(output, target_a, target_b)
    jax.block_until_ready(loss)
    assert loss.shape == (1,) and jnp.isfinite(loss).all()
    print("KERNEL_OK")
</pallas_src>

<mosaic_0001>
module attributes {stable_mosaic.version = 11 : i64} {
  func.func @_conv_mm_lrelu_kernel(%arg0: memref<2x36x256xf32, #tpu.memory_space<vmem>>, %arg1: memref<8x36xf32, #tpu.memory_space<vmem>>, %arg2: memref<8x1xf32, #tpu.memory_space<vmem>>, %arg3: memref<2x8x256xf32, #tpu.memory_space<vmem>>) attributes {dimension_semantics = [], scalar_prefetch = 0 : i64, scratch_operands = 0 : i64, tpu.core_type = #tpu.core_type<tc>} {
    %c0 = arith.constant 0 : index
    %c0_0 = arith.constant 0 : index
    %0 = vector.load %arg1[%c0, %c0_0] : memref<8x36xf32, #tpu.memory_space<vmem>>, vector<8x36xf32>
    %c0_1 = arith.constant 0 : index
    %c0_2 = arith.constant 0 : index
    %1 = vector.load %arg2[%c0_1, %c0_2] : memref<8x1xf32, #tpu.memory_space<vmem>>, vector<8x1xf32>
    %c0_3 = arith.constant 0 : index
    %c0_4 = arith.constant 0 : index
    %c0_5 = arith.constant 0 : index
    %2 = vector.load %arg0[%c0_3, %c0_4, %c0_5] : memref<2x36x256xf32, #tpu.memory_space<vmem>>, vector<1x36x256xf32>
    %3 = vector.shape_cast %2 : vector<1x36x256xf32> to vector<36x256xf32>
    %cst = arith.constant dense<0.000000e+00> : vector<8x256xf32>
    %4 = tpu.matmul %0, %3, %cst {dimension_numbers = #tpu.dot_dimension_numbers<[1], [0], [0], [1], [0, 0, 1, 1], [], []>} : vector<8x36xf32>, vector<36x256xf32>, vector<8x256xf32> -> vector<8x256xf32>
    %5 = vector.broadcast %1 : vector<8x1xf32> to vector<8x256xf32>
    %6 = arith.addf %4, %5 : vector<8x256xf32>
    %cst_6 = arith.constant 0.000000e+00 : f32
    %7 = vector.broadcast %cst_6 : f32 to vector<8x256xf32>
    %8 = arith.cmpf ogt, %6, %7 : vector<8x256xf32>
    %cst_7 = arith.constant 0.00999999977 : f32
    %9 = vector.broadcast %cst_7 : f32 to vector<8x256xf32>
    %10 = arith.mulf %9, %6 : vector<8x256xf32>
    %11 = arith.select %8, %6, %10 : vector<8x256xi1>, vector<8x256xf32>
    %c0_8 = arith.constant 0 : index
    %c0_9 = arith.constant 0 : index
    %c0_10 = arith.constant 0 : index
    %12 = vector.load %arg3[%c0_8, %c0_9, %c0_10] : memref<2x8x256xf32, #tpu.memory_space<vmem>>, vector<1x8x256xf32>
    %13 = vector.shape_cast %12 : vector<1x8x256xf32> to vector<8x256xf32>
    %14 = vector.shape_cast %11 : vector<8x256xf32> to vector<1x8x256xf32>
    tpu.vector_store %arg3[%c0_8, %c0_9, %c0_10], %14 {strides = array<i32>} : memref<2x8x256xf32, #tpu.memory_space<vmem>>, vector<1x8x256xf32>,
    %c1 = arith.constant 1 : index
    %c0_11 = arith.constant 0 : index
    %c0_12 = arith.constant 0 : index
    %15 = vector.load %arg0[%c1, %c0_11, %c0_12] : memref<2x36x256xf32, #tpu.memory_space<vmem>>, vector<1x36x256xf32>
    %16 = vector.shape_cast %15 : vector<1x36x256xf32> to vector<36x256xf32>
    %cst_13 = arith.constant dense<0.000000e+00> : vector<8x256xf32>
    %17 = tpu.matmul %0, %16, %cst_13 {dimension_numbers = #tpu.dot_dimension_numbers<[1], [0], [0], [1], [0, 0, 1, 1], [], []>} : vector<8x36xf32>, vector<36x256xf32>, vector<8x256xf32> -> vector<8x256xf32>
    %18 = vector.broadcast %1 : vector<8x1xf32> to vector<8x256xf32>
    %19 = arith.addf %17, %18 : vector<8x256xf32>
    %cst_14 = arith.constant 0.000000e+00 : f32
    %20 = vector.broadcast %cst_14 : f32 to vector<8x256xf32>
    %21 = arith.cmpf ogt, %19, %20 : vector<8x256xf32>
    %cst_15 = arith.constant 0.00999999977 : f32
    %22 = vector.broadcast %cst_15 : f32 to vector<8x256xf32>
    %23 = arith.mulf %22, %19 : vector<8x256xf32>
    %24 = arith.select %21, %19, %23 : vector<8x256xi1>, vector<8x256xf32>
    %c1_16 = arith.constant 1 : index
    %c0_17 = arith.constant 0 : index
    %c0_18 = arith.constant 0 : index
    %25 = vector.load %arg3[%c1_16, %c0_17, %c0_18] : memref<2x8x256xf32, #tpu.memory_space<vmem>>, vector<1x8x256xf32>
    %26 = vector.shape_cast %25 : vector<1x8x256xf32> to vector<8x256xf32>
    %27 = vector.shape_cast %24 : vector<8x256xf32> to vector<1x8x256xf32>
    tpu.vector_store %arg3[%c1_16, %c0_17, %c0_18], %27 {strides = array<i32>} : memref<2x8x256xf32, #tpu.memory_space<vmem>>, vector<1x8x256xf32>,
    return
  }
}

module attributes {stable_mosaic.version = 11 : i64} {
  func.func @kernel(%arg0: i32, %arg1: memref<2x8x256xf32, #tpu.memory_space<vmem>>, %arg2: memref<2x8x256xf32, #tpu.memory_space<vmem>>, %arg3: memref<1x1xf32, #tpu.memory_space<smem>>, %arg4: memref<2x8x8xf32, #tpu.memory_space<vmem>>, %arg5: memref<2x8x8xf32, #tpu.memory_space<vmem>>) attributes {dimension_semantics = [#tpu.dimension_semantics<arbitrary>], iteration_bounds = array<i64: 1>, scalar_prefetch = 0 : i64, scratch_operands = 2 : i64, tpu.core_type = #tpu.core_type<tc>, window_params = [{transform_indices = @transform_0, window_bounds = array<i64: 2, 8, 256>}, {transform_indices = @transform_1, window_bounds = array<i64: 2, 8, 256>}, {transform_indices = @transform_2, window_bounds = array<i64: 1, 1>}]} {
    %c0_i32 = arith.constant 0 : i32
    %0 = arith.cmpi eq, %arg0, %c0_i32 : i32
    %1 = arith.extui %0 : i1 to i32
    %c0_i32_0 = arith.constant 0 : i32
    %2 = arith.cmpi ne, %1, %c0_i32_0 : i32
    scf.if %2 {
      %cst_21 = arith.constant 0.000000e+00 : f32
      %16 = vector.broadcast %cst_21 : f32 to vector<2x8x8xf32>
      %c0_22 = arith.constant 0 : index
      %c0_23 = arith.constant 0 : index
      %c0_24 = arith.constant 0 : index
      %17 = vector.load %arg4[%c0_22, %c0_23, %c0_24] : memref<2x8x8xf32, #tpu.memory_space<vmem>>, vector<2x8x8xf32>
      tpu.vector_store %arg4[%c0_22, %c0_23, %c0_24], %16 {strides = array<i32>} : memref<2x8x8xf32, #tpu.memory_space<vmem>>, vector<2x8x8xf32>,
      %cst_25 = arith.constant 0.000000e+00 : f32
      %18 = vector.broadcast %cst_25 : f32 to vector<2x8x8xf32>
      %c0_26 = arith.constant 0 : index
      %c0_27 = arith.constant 0 : index
      %c0_28 = arith.constant 0 : index
      %19 = vector.load %arg5[%c0_26, %c0_27, %c0_28] : memref<2x8x8xf32, #tpu.memory_space<vmem>>, vector<2x8x8xf32>
      tpu.vector_store %arg5[%c0_26, %c0_27, %c0_28], %18 {strides = array<i32>} : memref<2x8x8xf32, #tpu.memory_space<vmem>>, vector<2x8x8xf32>,
    } else {
    }
    %c0 = arith.constant 0 : index
    %c0_1 = arith.constant 0 : index
    %c0_2 = arith.constant 0 : index
    %3 = vector.load %arg1[%c0, %c0_1, %c0_2] : memref<2x8x256xf32, #tpu.memory_space<vmem>>, vector<2x8x256xf32>
    %c0_3 = arith.constant 0 : index
    %c0_4 = arith.constant 0 : index
    %c0_5 = arith.constant 0 : index
    %4 = vector.load %arg2[%c0_3, %c0_4, %c0_5] : memref<2x8x256xf32, #tpu.memory_space<vmem>>, vector<2x8x256xf32>
    %c0_6 = arith.constant 0 : index
    %c0_7 = arith.constant 0 : index
    %c0_8 = arith.constant 0 : index
    %5 = vector.load %arg4[%c0_6, %c0_7, %c0_8] : memref<2x8x8xf32, #tpu.memory_space<vmem>>, vector<2x8x8xf32>
    %cst = arith.constant dense<0.000000e+00> : vector<2x8x8xf32>
    %6 = tpu.matmul %3, %3, %cst {dimension_numbers = #tpu.dot_dimension_numbers<[2], [2], [1], [1], [0, 0, 0, 1, 1, 1], [0], [0]>} : vector<2x8x256xf32>, vector<2x8x256xf32>, vector<2x8x8xf32> -> vector<2x8x8xf32>
    %7 = arith.addf %5, %6 : vector<2x8x8xf32>
    %c0_9 = arith.constant 0 : index
    %c0_10 = arith.constant 0 : index
    %c0_11 = arith.constant 0 : index
    %8 = vector.load %arg4[%c0_9, %c0_10, %c0_11] : memref<2x8x8xf32, #tpu.memory_space<vmem>>, vector<2x8x8xf32>
    tpu.vector_store %arg4[%c0_9, %c0_10, %c0_11], %7 {strides = array<i32>} : memref<2x8x8xf32, #tpu.memory_space<vmem>>, vector<2x8x8xf32>,
    %c0_12 = arith.constant 0 : index
    %c0_13 = arith.constant 0 : index
    %c0_14 = arith.constant 0 : index
    %9 = vector.load %arg5[%c0_12, %c0_13, %c0_14] : memref<2x8x8xf32, #tpu.memory_space<vmem>>, vector<2x8x8xf32>
    %cst_15 = arith.constant dense<0.000000e+00> : vector<2x8x8xf32>
    %10 = tpu.matmul %4, %4, %cst_15 {dimension_numbers = #tpu.dot_dimension_numbers<[2], [2], [1], [1], [0, 0, 0, 1, 1, 1], [0], [0]>} : vector<2x8x256xf32>, vector<2x8x256xf32>, vector<2x8x8xf32> -> vector<2x8x8xf32>
    %11 = arith.addf %9, %10 : vector<2x8x8xf32>
    %c0_16 = arith.constant 0 : index
    %c0_17 = arith.constant 0 : index
    %c0_18 = arith.constant 0 : index
    %12 = vector.load %arg5[%c0_16, %c0_17, %c0_18] : memref<2x8x8xf32, #tpu.memory_space<vmem>>, vector<2x8x8xf32>
    tpu.vector_store %arg5[%c0_16, %c0_17, %c0_18], %11 {strides = array<i32>} : memref<2x8x8xf32, #tpu.memory_space<vmem>>, vector<2x8x8xf32>,
    %c0_i32_19 = arith.constant 0 : i32
    %13 = arith.cmpi eq, %arg0, %c0_i32_19 : i32
    %14 = arith.extui %13 : i1 to i32
    %c0_i32_20 = arith.constant 0 : i32
    %15 = arith.cmpi ne, %14, %c0_i32_20 : i32
    scf.if %15 {
      %c0_21 = arith.constant 0 : index
      %c0_22 = arith.constant 0 : index
      %c0_23 = arith.constant 0 : index
      %16 = vector.load %arg4[%c0_21, %c0_22, %c0_23] : memref<2x8x8xf32, #tpu.memory_space<vmem>>, vector<2x8x8xf32>
      %c0_24 = arith.constant 0 : index
      %c0_25 = arith.constant 0 : index
      %c0_26 = arith.constant 0 : index
      %17 = vector.load %arg5[%c0_24, %c0_25, %c0_26] : memref<2x8x8xf32, #tpu.memory_space<vmem>>, vector<2x8x8xf32>
      %18 = arith.subf %16, %17 : vector<2x8x8xf32>
      %19 = math.absf %18 : vector<2x8x8xf32>
      %20 = vector.shape_cast %19 : vector<2x8x8xf32> to vector<1x2x8x8xf32>
      %cst_27 = arith.constant dense<0.000000e+00> : vector<1xf32>
      %21 = vector.multi_reduction <add>, %20, %cst_27 [1, 2, 3] : vector<1x2x8x8xf32> to vector<1xf32>
      %22 = vector.shape_cast %21 : vector<1xf32> to vector<1x1x1x1xf32>
      %23 = vector.extract %22[0, 0, 0, 0] : f32 from vector<1x1x1x1xf32>
      %cst_28 = arith.constant 2.048000e+03 : f32
      %24 = arith.divf %23, %cst_28 : f32
      %cst_29 = arith.constant 1.280000e+02 : f32
      %25 = arith.divf %24, %cst_29 : f32
      %c0_30 = arith.constant 0 : index
      %c0_31 = arith.constant 0 : index
      %26 = memref.load %arg3[%c0_30, %c0_31] : memref<1x1xf32, #tpu.memory_space<smem>>
      memref.store %25, %arg3[%c0_30, %c0_31] : memref<1x1xf32, #tpu.memory_space<smem>>
    } else {
    }
    return
  }
  func.func @transform_0(%arg0: i32) -> (i32, i32, i32) {
    %c0_i32 = arith.constant 0 : i32
    %c0_i32_0 = arith.constant 0 : i32
    %c0_i32_1 = arith.constant 0 : i32
    return %c0_i32, %c0_i32_0, %arg0 : i32, i32, i32
  }
  func.func @transform_1(%arg0: i32) -> (i32, i32, i32) {
    %c0_i32 = arith.constant 0 : i32
    %c0_i32_0 = arith.constant 0 : i32
    %c0_i32_1 = arith.constant 0 : i32
    return %c0_i32, %c0_i32_0, %arg0 : i32, i32, i32
  }
  func.func @transform_2(%arg0: i32) -> (i32, i32) {
    %c0_i32 = arith.constant 0 : i32
    %c0_i32_0 = arith.constant 0 : i32
    %c0_i32_1 = arith.constant 0 : i32
    return %c0_i32, %c0_i32_0 : i32, i32
  }
}

module attributes {stable_mosaic.version = 11 : i64} {
  func.func @kernel(%arg0: i32, %arg1: memref<2x8x256xf32, #tpu.memory_space<vmem>>, %arg2: memref<2x8x256xf32, #tpu.memory_space<vmem>>, %arg3: memref<1x1xf32, #tpu.memory_space<smem>>, %arg4: memref<1x1xf32, #tpu.memory_space<smem>>) attributes {dimension_semantics = [#tpu.dimension_semantics<arbitrary>], iteration_bounds = array<i64: 1>, scalar_prefetch = 0 : i64, scratch_operands = 1 : i64, tpu.core_type = #tpu.core_type<tc>, window_params = [{transform_indices = @transform_0, window_bounds = array<i64: 2, 8, 256>}, {transform_indices = @transform_1, window_bounds = array<i64: 2, 8, 256>}, {transform_indices = @transform_2, window_bounds = array<i64: 1, 1>}]} {
    %c0_i32 = arith.constant 0 : i32
    %0 = arith.cmpi eq, %arg0, %c0_i32 : i32
    %1 = arith.extui %0 : i1 to i32
    %c0_i32_0 = arith.constant 0 : i32
    %2 = arith.cmpi ne, %1, %c0_i32_0 : i32
    scf.if %2 {
      %cst_12 = arith.constant 0.000000e+00 : f32
      %c0_13 = arith.constant 0 : index
      %c0_14 = arith.constant 0 : index
      %17 = memref.load %arg4[%c0_13, %c0_14] : memref<1x1xf32, #tpu.memory_space<smem>>
      memref.store %cst_12, %arg4[%c0_13, %c0_14] : memref<1x1xf32, #tpu.memory_space<smem>>
    } else {
    }
    %c0 = arith.constant 0 : index
    %c0_1 = arith.constant 0 : index
    %3 = memref.load %arg4[%c0, %c0_1] : memref<1x1xf32, #tpu.memory_space<smem>>
    %c0_2 = arith.constant 0 : index
    %c0_3 = arith.constant 0 : index
    %c0_4 = arith.constant 0 : index
    %4 = vector.load %arg1[%c0_2, %c0_3, %c0_4] : memref<2x8x256xf32, #tpu.memory_space<vmem>>, vector<2x8x256xf32>
    %c0_5 = arith.constant 0 : index
    %c0_6 = arith.constant 0 : index
    %c0_7 = arith.constant 0 : index
    %5 = vector.load %arg2[%c0_5, %c0_6, %c0_7] : memref<2x8x256xf32, #tpu.memory_space<vmem>>, vector<2x8x256xf32>
    %6 = arith.subf %4, %5 : vector<2x8x256xf32>
    %7 = math.absf %6 : vector<2x8x256xf32>
    %8 = vector.shape_cast %7 : vector<2x8x256xf32> to vector<1x2x8x256xf32>
    %cst = arith.constant dense<0.000000e+00> : vector<1xf32>
    %9 = vector.multi_reduction <add>, %8, %cst [1, 2, 3] : vector<1x2x8x256xf32> to vector<1xf32>
    %10 = vector.shape_cast %9 : vector<1xf32> to vector<1x1x1x1xf32>
    %11 = vector.extract %10[0, 0, 0, 0] : f32 from vector<1x1x1x1xf32>
    %12 = arith.addf %3, %11 : f32
    %c0_8 = arith.constant 0 : index
    %c0_9 = arith.constant 0 : index
    %13 = memref.load %arg4[%c0_8, %c0_9] : memref<1x1xf32, #tpu.memory_space<smem>>
    memref.store %12, %arg4[%c0_8, %c0_9] : memref<1x1xf32, #tpu.memory_space<smem>>
    %c0_i32_10 = arith.constant 0 : i32
    %14 = arith.cmpi eq, %arg0, %c0_i32_10 : i32
    %15 = arith.extui %14 : i1 to i32
    %c0_i32_11 = arith.constant 0 : i32
    %16 = arith.cmpi ne, %15, %c0_i32_11 : i32
    scf.if %16 {
      %c0_12 = arith.constant 0 : index
      %c0_13 = arith.constant 0 : index
      %17 = memref.load %arg4[%c0_12, %c0_13] : memref<1x1xf32, #tpu.memory_space<smem>>
      %cst_14 = arith.constant 2.44140625E-4 : f32
      %18 = arith.mulf %17, %cst_14 : f32
      %c0_15 = arith.constant 0 : index
      %c0_16 = arith.constant 0 : index
      %19 = memref.load %arg3[%c0_15, %c0_16] : memref<1x1xf32, #tpu.memory_space<smem>>
      memref.store %18, %arg3[%c0_15, %c0_16] : memref<1x1xf32, #tpu.memory_space<smem>>
    } else {
    }
    return
  }
  func.func @transform_0(%arg0: i32) -> (i32, i32, i32) {
    %c0_i32 = arith.constant 0 : i32
    %c0_i32_0 = arith.constant 0 : i32
    %c0_i32_1 = arith.constant 0 : i32
    return %c0_i32, %c0_i32_0, %arg0 : i32, i32, i32
  }
  func.func @transform_1(%arg0: i32) -> (i32, i32, i32) {
    %c0_i32 = arith.constant 0 : i32
    %c0_i32_0 = arith.constant 0 : i32
    %c0_i32_1 = arith.constant 0 : i32
    return %c0_i32, %c0_i32_0, %arg0 : i32, i32, i32
  }
  func.func @transform_2(%arg0: i32) -> (i32, i32) {
    %c0_i32 = arith.constant 0 : i32
    %c0_i32_0 = arith.constant 0 : i32
    %c0_i32_1 = arith.constant 0 : i32
    return %c0_i32, %c0_i32_0 : i32, i32
  }
}

</mosaic_0001>

<bundles_post_ra>
// kernel: _lambda_.9
= control target key start
LH: loop header
LB: loop body
LE: loop exit
PB: predicated region body
PF: predicated region fallthrough
CT: control target
= control target key end

     0   :  { %s126_s0 = inlined_call_operand.vmem [shape: f32[2,8,256], index: 0, kind: input, shape index: {}]   ;;  %s127_s1 = inlined_call_operand.vmem [shape: f32[2,8,256], index: 1, kind: input, shape index: {}]   ;;  %s128_s2 = inlined_call_operand.hbm [shape: f32[1,1], index: 2, kind: output, shape index: {}]  }
   0x1   :  { %v19_v0 = vld [vmem:[%s126_s0] sm:$0xff]  ;;  %v20_v1 = vld [vmem:[%s126_s0 + $0x8] sm:$0xff]  ;;  %v21_v2 = vld [vmem:[%s126_s0 + $0x10] sm:$0xff] }
   0x2   :  { %v22_v3 = vld [vmem:[%s126_s0 + $0x18] sm:$0xff]  ;;  %v23_v4 = vld [vmem:[%s127_s1] sm:$0xff]  ;;  %v24_v5 = vld [vmem:[%s127_s1 + $0x8] sm:$0xff] }
   0x3   :  { %v25_v6 = vld [vmem:[%s127_s1 + $0x10] sm:$0xff]  ;;  %v26_v7 = vld [vmem:[%s127_s1 + $0x18] sm:$0xff]  ;;  %v27_v8 = vsub.f32 %v19_v0, %v23_v4  ;;  %v28_v9 = vsub.f32 %v20_v1, %v24_v5 }
   0x4   :  { %7 = vsyncpa [#allocation4], 0  ;;  %v29_v10 = vsub.f32 %v21_v2, %v25_v6  ;;  %v30_v11 = vsub.f32 %v22_v3, %v26_v7  ;;  %s83_s25 = smov [#allocation3]  }
   0x5   :  { %v31_v12 = vand.u32 2147483647, %v27_v8  ;;  %v32_v13 = vand.u32 2147483647, %v28_v9 }
   0x6   :  { %v33_v14 = vand.u32 2147483647, %v29_v10  ;;  %v34_v15 = vand.u32 2147483647, %v30_v11 }
   0x7   :  { %v35_v16 = vadd.f32 %v32_v13, %v31_v12 }
   0x9   :  { %v36_v17 = vadd.f32 %v35_v16, %v33_v14 }
   0xb   :  { %v37_v18 = vadd.f32 %v36_v17, %v34_v15 }
   0xd   :  { %38 = vadd.xlane.f32.xlu0 %v37_v18 }
  0x96   :  { %v39_v19 = vpop.xlane.xlu0 %38 }
  0x97   :  { %v40_v20 = vrot.slane %v39_v19, 4 }
  0x99   :  { %v41_v21 = vadd.f32 %v40_v20, %v39_v19 }
  0x9b   :  { %v42_v22 = vrot.slane %v41_v21, 2 }
  0x9d   :  { %v43_v23 = vadd.f32 %v42_v22, %v41_v21 }
  0x9f   :  { %v44_v24 = vrot.slane %v43_v23, 1 }
  0xa1   :  { %v45_v25 = vadd.f32 %v44_v24, %v43_v23 }
  0xa3   :  { %70 = vpush %v45_v25 }
  0xd4   :  { %s71_s0 = spop %70 }
  0xd5   :  { %s54_s1 = smul.f32 0.00024414063, %s71_s0 }
  0xd7   :  { %56 = sst [smem:[#allocation3]] %s54_s1 }
  0xd8   :  { %64 = dma.smem_to_hbm %s83_s25, 16, %s128_s2, [#allocation4]  }
  0xd9   :  { %81 = dma.done.wait [#allocation4], 16  }
  0xda   :  { %82 = vsyncadd [#allocation4], 4294967280 }
  0xdb   :  { %68 = sfence }
  0xdc   :  { %69 = vsyncpa [#allocation4], 1 }

// kernel: _lambda_.5
= control target key start
LH: loop header
LB: loop body
LE: loop exit
PB: predicated region body
PF: predicated region fallthrough
CT: control target
= control target key end

     0   :  { %vm35_vm0 = vcmask 1043456   ;;  %v243_v3 = vmov 0.0   ;;  %vm31_vm1 = vcmask 293888   ;;  %v244_v23 = vmov 0   ;;  %s343_s0 = inlined_call_operand.vmem [shape: f32[2,36,256], index: 0, kind: input, shape index: {}]   ;;  %s344_s1 = inlined_call_operand.vmem [shape: f32[8,36], index: 1, kind: input, shape index: {}]   ;;  %s345_s2 = inlined_call_operand.vmem [shape: f32[8,1], index: 2, kind: input, shape index: {}]   ;;  %s346_s3 = inlined_call_operand.vmem [shape: f32[2,8,256], index: 3, kind: output, shape index: {}]  }
   0x1   :  { %v25_v0 = vld [vmem:[%s343_s0 + $0x48] sm:$0xf]  ;;  %v234_v1 = vld [vmem:[%s343_s0 + $0x98] sm:$0xf]  ;;  %v24_v2 = vld [vmem:[%s343_s0 + $0x40] sm:$0xf]  ;;  %106 = vmatprep.mubr.f32.mxu0 %v243_v3  ;;  %202 = vmatprep.mubr.f32.mxu1 %v243_v3 }
   0x2   :  { %222 = vmatprep.subr.msk.mxu0 %vm35_vm0, %v25_v0  ;;  %235 = vmatprep.subr.msk.mxu1 %vm35_vm0, %v234_v1  ;;  %v233_v4 = vld [vmem:[%s343_s0 + $0x90] sm:$0xf]  ;;  %v23_v5 = vld [vmem:[%s343_s0 + $0x38] sm:$0xff]  ;;  %v232_v6 = vld [vmem:[%s343_s0 + $0x88] sm:$0xff] }
   0x3   :  { %223 = vmatpush1.msk.msra.mxu0 %vm35_vm0, %v24_v2  ;;  %236 = vmatpush1.msk.msra.mxu1 %vm35_vm0, %v233_v4  ;;  %v22_v7 = vld [vmem:[%s343_s0 + $0x30] sm:$0xff]  ;;  %v231_v8 = vld [vmem:[%s343_s0 + $0x80] sm:$0xff]  ;;  %v21_v9 = vld [vmem:[%s343_s0 + $0x28] sm:$0xff] }
   0x4   :  { %66 = vmatprep.subr.mxu0 %v23_v5  ;;  %162 = vmatprep.subr.mxu1 %v232_v6  ;;  %v230_v10 = vld [vmem:[%s343_s0 + $0x78] sm:$0xff]  ;;  %v20_v11 = vld [vmem:[%s343_s0 + $0x20] sm:$0xff]  ;;  %v229_v12 = vld [vmem:[%s343_s0 + $0x70] sm:$0xff] }
   0x5   :  { %67 = vmatpush1.msra.mxu0 %v22_v7  ;;  %163 = vmatpush1.msra.mxu1 %v231_v8  ;;  %v19_v13 = vld [vmem:[%s343_s0 + $0x18] sm:$0xff]  ;;  %v228_v14 = vld [vmem:[%s343_s0 + $0x68] sm:$0xff]  ;;  %v18_v15 = vld [vmem:[%s343_s0 + $0x10] sm:$0xff] }
   0x6   :  { %68 = vmatprep.subr.mxu0 %v21_v9  ;;  %164 = vmatprep.subr.mxu1 %v230_v10  ;;  %v227_v16 = vld [vmem:[%s343_s0 + $0x60] sm:$0xff]  ;;  %v17_v17 = vld [vmem:[%s343_s0 + $0x8] sm:$0xff]  ;;  %v226_v18 = vld [vmem:[%s343_s0 + $0x58] sm:$0xff] }
   0x7   :  { %69 = vmatpush1.msra.mxu0 %v20_v11  ;;  %165 = vmatpush1.msra.mxu1 %v229_v12  ;;  %v16_v19 = vld [vmem:[%s343_s0] sm:$0xff]  ;;  %v225_v20 = vld [vmem:[%s343_s0 + $0x50] sm:$0xff] }
   0x8   :  { %70 = vmatprep.subr.mxu0 %v19_v13  ;;  %166 = vmatprep.subr.mxu1 %v228_v14  ;;  %v14_v21 = vld [vmem:[%s344_s1] sm:$0xff] }
   0x9   :  { %71 = vmatpush1.msra.mxu0 %v18_v15  ;;  %167 = vmatpush1.msra.mxu1 %v227_v16  ;;  %v15_v22 = vld [vmem:[%s345_s2] sm:$0xff] }
   0xa   :  { %72 = vmatprep.subr.mxu0 %v17_v17  ;;  %168 = vmatprep.subr.mxu1 %v226_v18 }
   0xb   :  { %73 = vmatpush1.msra.mxu0 %v16_v19  ;;  %169 = vmatpush1.msra.mxu1 %v225_v20 }
   0xc   :  { %224 = vmatmul.mubr.msk.f32.vlgmr.msra.gmra.mxu0 %vm31_vm1, %v14_v21  ;;  %237 = vmatmul.mubr.msk.f32.vlgmr.msra.gmra.mxu1 %vm31_vm1, %v14_v21 }
   0xd   :  { %242 = vset.pattern.permute.xlu0 %v244_v23 }
   0xe   :  { %28 = vperm.xlu0 %242, %v15_v22  }
  0x89   :  { %v29_v24 = vpop.permute.xlu0 %28 }
  0xcc   :  { %v108_v25 = vpop.f32.mrf.mxu0  ;;  %v204_v26 = vpop.f32.mrf.mxu1 }
  0xcd   :  { %v109_v27 = vadd.f32 %v108_v25, %v29_v24  ;;  %v205_v28 = vadd.f32 %v204_v26, %v29_v24 }
  0xce   :  { %v110_v29 = vpop.f32.mrf.mxu0  ;;  %v206_v30 = vpop.f32.mrf.mxu1 }
  0xcf   :  { %vm113_vm2 = vcmp.gt.f32.partialorder %v109_v27, 0.0  ;;  %v115_v31 = vmul.f32 0.01, %v109_v27  ;;  %vm209_vm3 = vcmp.gt.f32.partialorder %v205_v28, 0.0  ;;  %v211_v32 = vmul.f32 0.01, %v205_v28 }
  0xd0   :  { %v111_v33 = vadd.f32 %v110_v29, %v29_v24  ;;  %v207_v34 = vadd.f32 %v206_v30, %v29_v24 }
  0xd1   :  { %v117_v35 = vsel %vm113_vm2, %v109_v27, %v115_v31  ;;  %v213_v36 = vsel %vm209_vm3, %v205_v28, %v211_v32 }
  0xd2   :  { %119 = vst [vmem:[%s346_s3] sm:$0xff] %v117_v35  ;;  %238 = vst [vmem:[%s346_s3 + $0x10] sm:$0xff] %v213_v36  ;;  %vm114_vm4 = vcmp.gt.f32.partialorder %v111_v33, 0.0  ;;  %v116_v37 = vmul.f32 0.01, %v111_v33  ;;  %vm210_vm5 = vcmp.gt.f32.partialorder %v207_v34, 0.0 }
  0xd3   :  { %v212_v38 = vmul.f32 0.01, %v207_v34 }
  0xd4   :  { %v118_v39 = vsel %vm114_vm4, %v111_v33, %v116_v37 }
  0xd5   :  { %v214_v40 = vsel %vm210_vm5, %v207_v34, %v212_v38  ;;  %120 = vst [vmem:[%s346_s3 + $0x8] sm:$0xff] %v118_v39 }
  0xd6   :  { %239 = vst [vmem:[%s346_s3 + $0x18] sm:$0xff] %v214_v40 }

// kernel: _lambda_.7
= control target key start
LH: loop header
LB: loop body
LE: loop exit
PB: predicated region body
PF: predicated region fallthrough
CT: control target
= control target key end

     0   :  { %vm16_vm0 = vcmask 64512   ;;  %v380_v6 = vmov 0.0   ;;  %s434_s0 = inlined_call_operand.vmem [shape: f32[2,8,256], index: 0, kind: input, shape index: {}]   ;;  %s435_s1 = inlined_call_operand.vmem [shape: f32[2,8,256], index: 1, kind: input, shape index: {}]   ;;  %s436_s2 = inlined_call_operand.hbm [shape: f32[1,1], index: 2, kind: output, shape index: {}]  }
   0x1   :  { %v22_v0 = vld [vmem:[%s434_s0 + $0x8] sm:$0xff]  ;;  %v24_v1 = vld [vmem:[%s434_s0 + $0x18] sm:$0xff]  ;;  %v21_v2 = vld [vmem:[%s434_s0] sm:$0xff]  ;;  %17 = vst.msk [vmem:[#allocation2] sm:$0xff] %vm16_vm0, %v380_v6 }
   0x2   :  { %61 = vmatprep.subr.mxu0 %v22_v0  ;;  %131 = vmatprep.subr.mxu1 %v24_v1  ;;  %v23_v3 = vld [vmem:[%s434_s0 + $0x10] sm:$0xff]  ;;  %v26_v4 = vld [vmem:[%s435_s1 + $0x8] sm:$0xff]  ;;  %v28_v5 = vld [vmem:[%s435_s1 + $0x18] sm:$0xff]  ;;  %18 = vst.msk [vmem:[#allocation2 + $0x8] sm:$0xff] %vm16_vm0, %v380_v6 }
   0x3   :  { %19 = vst.msk [vmem:[#allocation3] sm:$0xff] %vm16_vm0, %v380_v6  ;;  %20 = vst.msk [vmem:[#allocation3 + $0x8] sm:$0xff] %vm16_vm0, %v380_v6  ;;  %62 = vmatpush1.xpose.msra.mxu0 %v21_v2  ;;  %132 = vmatpush1.xpose.msra.mxu1 %v23_v3 }
   0x4   :  { %7 = vsyncpa [#allocation5], 0  ;;  %95 = vmatprep.mubr.f32.mxu0 %v22_v0  ;;  %165 = vmatprep.mubr.f32.mxu1 %v24_v1  ;;  %v25_v7 = vld [vmem:[%s435_s1] sm:$0xff]  ;;  %v27_v8 = vld [vmem:[%s435_s1 + $0x10] sm:$0xff]  ;;  %s381_s26 = smov [#allocation4]  }
   0x5   :  { %208 = vmatprep.subr.mxu0 %v26_v4  ;;  %278 = vmatprep.subr.mxu1 %v28_v5 }
   0x6   :  { %96 = vmatmul.mubr.f32.vlgmr.msra.gmra.mxu0 %v21_v2  ;;  %166 = vmatmul.mubr.f32.vlgmr.msra.gmra.mxu1 %v23_v3 }
   0x7   :  { %209 = vmatpush1.xpose.msra.mxu0 %v25_v7  ;;  %279 = vmatpush1.xpose.msra.mxu1 %v27_v8 }
   0x8   :  { %242 = vmatprep.mubr.f32.mxu0 %v26_v4  ;;  %312 = vmatprep.mubr.f32.mxu1 %v28_v5  ;;  %v29_v9 = vld [vmem:[#allocation2] sm:$0xff] }
   0x9   :  { %v30_v10 = vld [vmem:[#allocation2 + $0x8] sm:$0xff] }
   0xa   :  { %243 = vmatmul.mubr.f32.vlgmr.msra.gmra.mxu0 %v25_v7  ;;  %313 = vmatmul.mubr.f32.vlgmr.msra.gmra.mxu1 %v27_v8  ;;  %v176_v17 = vld [vmem:[#allocation3] sm:$0xff]  ;;  %v177_v18 = vld [vmem:[#allocation3 + $0x8] sm:$0xff] }
  0xc6   :  { %v97_v11 = vpop.f32.mrf.mxu0  ;;  %v167_v12 = vpop.f32.mrf.mxu1 }
  0xc7   :  { %v171_v13 = vadd.f32 %v97_v11, %v29_v9  ;;  %v172_v14 = vadd.f32 %v167_v12, %v30_v10 }
  0xc8   :  { %v99_v15 = vpop.f32.mrf.mxu0  ;;  %v169_v16 = vpop.f32.mrf.mxu1 }
  0xc9   :  { %174 = vst.msk [vmem:[#allocation2] sm:$0xff] %vm16_vm0, %v171_v13  ;;  %175 = vst.msk [vmem:[#allocation2 + $0x8] sm:$0xff] %vm16_vm0, %v172_v14 }
  0xca   :  { %v244_v19 = vpop.f32.mrf.mxu0  ;;  %v314_v20 = vpop.f32.mrf.mxu1 }
  0xcb   :  { %v318_v21 = vadd.f32 %v244_v19, %v176_v17  ;;  %v319_v22 = vadd.f32 %v314_v20, %v177_v18 }
  0xcc   :  { %v246_v23 = vpop.f32.mrf.mxu0  ;;  %v316_v24 = vpop.f32.mrf.mxu1 }
  0xcd   :  { %320 = vst.msk [vmem:[#allocation3] sm:$0xff] %vm16_vm0, %v318_v21  ;;  %321 = vst.msk [vmem:[#allocation3 + $0x8] sm:$0xff] %vm16_vm0, %v319_v22 }
  0xd0   :  { %v325_v25 = vld [vmem:[#allocation2] sm:$0xff]  ;;  %v326_v26 = vld [vmem:[#allocation2 + $0x8] sm:$0xff] }
  0xd4   :  { %v327_v27 = vld [vmem:[#allocation3] sm:$0xff]  ;;  %v328_v28 = vld [vmem:[#allocation3 + $0x8] sm:$0xff] }
  0xd5   :  { %v329_v29 = vsub.f32 %v325_v25, %v327_v27  ;;  %v330_v30 = vsub.f32 %v326_v26, %v328_v28 }
  0xd7   :  { %v331_v31 = vand.u32 2147483647, %v329_v29  ;;  %v332_v32 = vand.u32 2147483647, %v330_v30 }
  0xd9   :  { %v333_v33 = vsel %vm16_vm0, %v331_v31, 0.0  ;;  %v334_v34 = vsel %vm16_vm0, %v332_v32, 0.0 }
  0xda   :  { %v335_v35 = vadd.f32 %v334_v34, %v333_v33 }
  0xdc   :  { %336 = vadd.xlane.f32.xlu0 %v335_v35 }
 0x165   :  { %v337_v36 = vpop.xlane.xlu0 %336 }
 0x166   :  { %v338_v37 = vrot.slane %v337_v36, 4 }
 0x168   :  { %v339_v38 = vadd.f32 %v338_v37, %v337_v36 }
 0x16a   :  { %v340_v39 = vrot.slane %v339_v38, 2 }
 0x16c   :  { %v341_v40 = vadd.f32 %v340_v39, %v339_v38 }
 0x16e   :  { %v342_v41 = vrot.slane %v341_v40, 1 }
 0x170   :  { %v343_v42 = vadd.f32 %v342_v41, %v341_v40 }
 0x172   :  { %366 = vpush %v343_v42 }
 0x1a3   :  { %s367_s1 = spop %366 }
 0x1a4   :  { %s347_s24 = smul.f32 0.00048828125, %s367_s1 }
 0x1a6   :  { %s350_s25 = smul.f32 0.0078125, %s347_s24 }
 0x1a8   :  { %352 = sst [smem:[#allocation4]] %s350_s25 }
 0x1a9   :  { %360 = dma.smem_to_hbm %s381_s26, 16, %s436_s2, [#allocation5]  }
 0x1aa   :  { %378 = dma.done.wait [#allocation5], 16  }
 0x1ab   :  { %379 = vsyncadd [#allocation5], 4294967280 }
 0x1ac   :  { %364 = sfence }
 0x1ad   :  { %365 = vsyncpa [#allocation5], 1 }

</bundles_post_ra>
